<compile_context>
chip_gen: v7x
topology: tpu7x:2x2x1
jax: 0.10.0
libtpu: 0.0.40
codegen_flags: <defaults>
</compile_context>

<pallas_src>
import jax
import jax.numpy as jnp
from jax.experimental import pallas as pl
from jax.experimental.pallas import tpu as pltpu

LN_EPS = 1e-5  # nn.LayerNorm default


def _conv_relu_ln_kernel(x_ref, w_ref, p_ref, o_ref):
    # x_ref: (C_in, tn)    input slab for one batch element / N-tile (lane dim = N)
    # w_ref: (C_out, C_in) conv weight (kernel_size=1, squeezed)
    # p_ref: (C_out, 3)    packed params: [:,0]=conv bias, [:,1]=LN gamma, [:,2]=LN beta
    # o_ref: (C_out, tn)
    x = x_ref[...]                        # native dtype; MXU takes bf16/f32 directly
    w = w_ref[...]
    p = p_ref[...].astype(jnp.float32)
    bias = p[:, 0:1]                      # (C_out, 1) broadcast over lanes
    gamma = p[:, 1:2]
    beta = p[:, 2:3]

    # Conv1d with kernel_size=1 == matmul, f32 accumulation on the MXU.
    y = jnp.dot(w, x, preferred_element_type=jnp.float32) + bias   # (C_out, tn)

    # ReLU
    y = jnp.maximum(y, 0.0)

    # LayerNorm over channels (sublane axis 0), single reduction sweep:
    # var = E[y^2] - E[y]^2 (clamped >= 0 to guard cancellation; values are post-ReLU f32).
    inv_c = 1.0 / y.shape[0]
    mean = jnp.sum(y, axis=0, keepdims=True) * inv_c               # (1, tn)
    mean_sq = jnp.sum(y * y, axis=0, keepdims=True) * inv_c        # (1, tn)
    var = jnp.maximum(mean_sq - mean * mean, 0.0)
    scale = jax.lax.rsqrt(var + LN_EPS)                            # (1, tn), EUP

    # Fused epilogue: normalize, then per-channel affine in one multiply-add chain.
    o_ref[...] = (((y - mean) * scale) * gamma + beta).astype(o_ref.dtype)


def _round_up(a, b):
    return -(-a // b) * b


def conv_relu_ln1d(x, conv_w, conv_b, ln_g, ln_b, *,
                   target_step_bytes=2 << 20, vmem_budget_bytes=40 << 20):
    """x: (B, C_in, N) -> (B, C_out, N), matching ConvReLULN1D.forward."""
    B, C_in, N = x.shape
    C_out = conv_w.shape[0]
    assert conv_w.shape == (C_out, C_in, 1)

    w2d = conv_w[:, :, 0]                                          # (C_out, C_in)
    if x.dtype == jnp.bfloat16:
        # Matched bf16 MXU operands (no silent upcast) and halved weight DMA.
        w2d = w2d.astype(jnp.bfloat16)
    params = jnp.stack(
        [conv_b.astype(jnp.float32),
         ln_g.astype(jnp.float32),
         ln_b.astype(jnp.float32)], axis=1)                        # (C_out, 3)

    itemsize = x.dtype.itemsize

    # ---- lane-tile derivation (always lane-dense, bytes-per-step sized) ----
    n_pad128 = _round_up(N, 128)
    total_lanes = n_pad128 // 128                                  # in units of 128 lanes

    bytes_per_lane_io = (C_in + C_out) * itemsize                  # x + out bytes per lane
    tn_want = max(128, (target_step_bytes // bytes_per_lane_io) // 128 * 128)

    # VMEM cap (conservative, v7x 64 MiB-safe): double-buffered x/out tiles +
    # ~3 f32 (C_out, tn) slab temporaries + double-buffered weight/params.
    fixed_bytes = 2 * (C_out * C_in * w2d.dtype.itemsize + C_out * 3 * 4)
    per_lane_vmem = 2 * bytes_per_lane_io + 3 * C_out * 4
    tn_cap = max(128, ((vmem_budget_bytes - fixed_bytes) // per_lane_vmem) // 128 * 128)
    tn_want = min(tn_want, tn_cap, 16384)

    num_tiles = max(1, -(-n_pad128 // tn_want))
    # v7x has 2 TensorCores: avoid a degenerate single-step grid when splittable.
    if B * num_tiles < 2 and total_lanes >= 2:
        num_tiles = 2
    tn = -(-total_lanes // num_tiles) * 128                        # multiple of 128
    n_pad = num_tiles * tn

    x_in = x if n_pad == N else jnp.pad(x, ((0, 0), (0, 0), (0, n_pad - N)))
    grid = (B, num_tiles)

    cost = pl.CostEstimate(
        flops=2 * B * n_pad * C_in * C_out + 8 * B * n_pad * C_out,
        transcendentals=B * n_pad,                                 # one rsqrt per point
        bytes_accessed=B * (C_in + C_out) * n_pad * itemsize
        + w2d.size * w2d.dtype.itemsize + params.size * 4,
    )

    out = pl.pallas_call(
        _conv_relu_ln_kernel,
        out_shape=jax.ShapeDtypeStruct((B, C_out, n_pad), x.dtype),
        grid_spec=pltpu.PrefetchScalarGridSpec(
            num_scalar_prefetch=0,
            grid=grid,
            in_specs=[
                pl.BlockSpec((None, C_in, tn), lambda b, j: (b, 0, j)),
                pl.BlockSpec((C_out, C_in), lambda b, j: (0, 0)),
                pl.BlockSpec((C_out, 3), lambda b, j: (0, 0)),
            ],
            out_specs=pl.BlockSpec((None, C_out, tn), lambda b, j: (b, 0, j)),
        ),
        compiler_params=pltpu.CompilerParams(
            dimension_semantics=("parallel", "parallel"),
            # Past v5e's 16 MiB scoped default and v6e/v7x's 32 MiB; actual usage is
            # capped well below this by the tn derivation above (v7x physical = 64 MiB).
            vmem_limit_bytes=64 * 1024 * 1024,
        ),
        cost_estimate=cost,
    )(x_in, w2d, params)

    return out if n_pad == N else out[:, :, :N]


def _reference(x, conv_w, conv_b, ln_g, ln_b):
    # Pure-JAX reference of ConvReLULN1D.forward (for correctness check).
    y = jnp.einsum("oc,bcn->bon", conv_w[:, :, 0], x) + conv_b[None, :, None]
    y = jnp.maximum(y, 0.0)
    y = jnp.transpose(y, (0, 2, 1))                                # (B, N, C_out)
    mean = jnp.mean(y, axis=-1, keepdims=True)
    var = jnp.mean((y - mean) ** 2, axis=-1, keepdims=True)
    y = (y - mean) / jnp.sqrt(var + LN_EPS) * ln_g + ln_b
    return jnp.transpose(y, (0, 2, 1))                             # (B, C_out, N)


if __name__ == "__main__":
    # Small shapes consistent with the module: Conv1d input is (B, C_in, N).
    B, C_in, C_out, N = 2, 4, 32, 16

    key = jax.random.PRNGKey(0)
    k_x, k_w, k_b = jax.random.split(key, 3)

    x = jax.random.normal(k_x, (B, C_in, N), dtype=jnp.float32)

    # Deterministic parameter init (shapes from nn.Conv1d / nn.LayerNorm):
    #   conv weight: (out_channels, in_channels, 1), conv bias: (out_channels,)
    #   LayerNorm weight=ones, bias=zeros (PyTorch default init).
    fan_in = C_in * 1
    bound = 1.0 / (fan_in ** 0.5)
    conv_w = jax.random.uniform(k_w, (C_out, C_in, 1), jnp.float32, -bound, bound)
    conv_b = jax.random.uniform(k_b, (C_out,), jnp.float32, -bound, bound)
    ln_g = jnp.ones((C_out,), jnp.float32)
    ln_b = jnp.zeros((C_out,), jnp.float32)

    out = conv_relu_ln1d(x, conv_w, conv_b, ln_g, ln_b)
    jax.block_until_ready(out)
    assert out.shape == (B, C_out, N)

    ref = _reference(x, conv_w, conv_b, ln_g, ln_b)
    assert jnp.allclose(out, ref, atol=1e-4, rtol=1e-4)
    print("KERNEL_OK")
</pallas_src>

<mosaic_0001>
module attributes {stable_mosaic.version = 11 : i64} {
  func.func @_conv_relu_ln_kernel(%arg0: i32, %arg1: i32, %arg2: memref<1x4x128xf32, #tpu.memory_space<vmem>>, %arg3: memref<32x4xf32, #tpu.memory_space<vmem>>, %arg4: memref<32x3xf32, #tpu.memory_space<vmem>>, %arg5: memref<1x32x128xf32, #tpu.memory_space<vmem>>) attributes {dimension_semantics = [#tpu.dimension_semantics<parallel>, #tpu.dimension_semantics<parallel>], iteration_bounds = array<i64: 2, 1>, scalar_prefetch = 0 : i64, scratch_operands = 0 : i64, tpu.core_type = #tpu.core_type<tc>, window_params = [{transform_indices = @transform_0, window_bounds = array<i64: 1, 4, 128>}, {pipeline_mode = #tpu.pipeline_mode<synchronous>, transform_indices = @transform_1, window_bounds = array<i64: 32, 4>}, {pipeline_mode = #tpu.pipeline_mode<synchronous>, transform_indices = @transform_2, window_bounds = array<i64: 32, 3>}, {transform_indices = @transform_3, window_bounds = array<i64: 1, 32, 128>}]} {
    %c0 = arith.constant 0 : index
    %c0_0 = arith.constant 0 : index
    %c0_1 = arith.constant 0 : index
    %0 = vector.load %arg2[%c0, %c0_0, %c0_1] : memref<1x4x128xf32, #tpu.memory_space<vmem>>, vector<1x4x128xf32>
    %1 = vector.shape_cast %0 : vector<1x4x128xf32> to vector<4x128xf32>
    %c0_2 = arith.constant 0 : index
    %c0_3 = arith.constant 0 : index
    %2 = vector.load %arg3[%c0_2, %c0_3] : memref<32x4xf32, #tpu.memory_space<vmem>>, vector<32x4xf32>
    %c0_4 = arith.constant 0 : index
    %c0_5 = arith.constant 0 : index
    %3 = vector.load %arg4[%c0_4, %c0_5] : memref<32x3xf32, #tpu.memory_space<vmem>>, vector<32x3xf32>
    %4 = vector.extract_strided_slice %3 {offsets = [0, 0], sizes = [32, 1], strides = [1, 1]} : vector<32x3xf32> to vector<32x1xf32>
    %5 = vector.extract_strided_slice %3 {offsets = [0, 1], sizes = [32, 1], strides = [1, 1]} : vector<32x3xf32> to vector<32x1xf32>
    %6 = vector.extract_strided_slice %3 {offsets = [0, 2], sizes = [32, 1], strides = [1, 1]} : vector<32x3xf32> to vector<32x1xf32>
    %cst = arith.constant dense<0.000000e+00> : vector<32x128xf32>
    %7 = tpu.matmul %2, %1, %cst {dimension_numbers = #tpu.dot_dimension_numbers<[1], [0], [0], [1], [0, 0, 1, 1], [], []>} : vector<32x4xf32>, vector<4x128xf32>, vector<32x128xf32> -> vector<32x128xf32>
    %8 = vector.broadcast %4 : vector<32x1xf32> to vector<32x128xf32>
    %9 = arith.addf %7, %8 : vector<32x128xf32>
    %cst_6 = arith.constant 0.000000e+00 : f32
    %10 = vector.broadcast %cst_6 : f32 to vector<32x128xf32>
    %11 = arith.maximumf %9, %10 : vector<32x128xf32>
    %cst_7 = arith.constant dense<0.000000e+00> : vector<128xf32>
    %12 = vector.multi_reduction <add>, %11, %cst_7 [0] : vector<32x128xf32> to vector<128xf32>
    %13 = vector.shape_cast %12 : vector<128xf32> to vector<1x128xf32>
    %cst_8 = arith.constant 3.125000e-02 : f32
    %14 = vector.broadcast %cst_8 : f32 to vector<1x128xf32>
    %15 = arith.mulf %13, %14 : vector<1x128xf32>
    %16 = arith.mulf %11, %11 : vector<32x128xf32>
    %cst_9 = arith.constant dense<0.000000e+00> : vector<128xf32>
    %17 = vector.multi_reduction <add>, %16, %cst_9 [0] : vector<32x128xf32> to vector<128xf32>
    %18 = vector.shape_cast %17 : vector<128xf32> to vector<1x128xf32>
    %cst_10 = arith.constant 3.125000e-02 : f32
    %19 = vector.broadcast %cst_10 : f32 to vector<1x128xf32>
    %20 = arith.mulf %18, %19 : vector<1x128xf32>
    %21 = arith.mulf %15, %15 : vector<1x128xf32>
    %22 = arith.subf %20, %21 : vector<1x128xf32>
    %cst_11 = arith.constant 0.000000e+00 : f32
    %23 = vector.broadcast %cst_11 : f32 to vector<1x128xf32>
    %24 = arith.maximumf %22, %23 : vector<1x128xf32>
    %cst_12 = arith.constant 9.99999974E-6 : f32
    %25 = vector.broadcast %cst_12 : f32 to vector<1x128xf32>
    %26 = arith.addf %24, %25 : vector<1x128xf32>
    %27 = math.rsqrt %26 : vector<1x128xf32>
    %28 = vector.broadcast %15 : vector<1x128xf32> to vector<32x128xf32>
    %29 = arith.subf %11, %28 : vector<32x128xf32>
    %30 = vector.broadcast %27 : vector<1x128xf32> to vector<32x128xf32>
    %31 = arith.mulf %29, %30 : vector<32x128xf32>
    %32 = vector.broadcast %5 : vector<32x1xf32> to vector<32x128xf32>
    %33 = arith.mulf %31, %32 : vector<32x128xf32>
    %34 = vector.broadcast %6 : vector<32x1xf32> to vector<32x128xf32>
    %35 = arith.addf %33, %34 : vector<32x128xf32>
    %c0_13 = arith.constant 0 : index
    %c0_14 = arith.constant 0 : index
    %c0_15 = arith.constant 0 : index
    %36 = vector.load %arg5[%c0_13, %c0_14, %c0_15] : memref<1x32x128xf32, #tpu.memory_space<vmem>>, vector<1x32x128xf32>
    %37 = vector.shape_cast %36 : vector<1x32x128xf32> to vector<32x128xf32>
    %38 = vector.shape_cast %35 : vector<32x128xf32> to vector<1x32x128xf32>
    tpu.vector_store %arg5[%c0_13, %c0_14, %c0_15], %38 {strides = array<i32>} : memref<1x32x128xf32, #tpu.memory_space<vmem>>, vector<1x32x128xf32>,
    return
  }
  func.func @transform_0(%arg0: i32, %arg1: i32) -> (i32, i32, i32) {
    %c0_i32 = arith.constant 0 : i32
    %c0_i32_0 = arith.constant 0 : i32
    return %arg0, %c0_i32, %arg1 : i32, i32, i32
  }
  func.func @transform_1(%arg0: i32, %arg1: i32) -> (i32, i32) {
    %c0_i32 = arith.constant 0 : i32
    %c0_i32_0 = arith.constant 0 : i32
    %c0_i32_1 = arith.constant 0 : i32
    return %c0_i32, %c0_i32_0 : i32, i32
  }
  func.func @transform_2(%arg0: i32, %arg1: i32) -> (i32, i32) {
    %c0_i32 = arith.constant 0 : i32
    %c0_i32_0 = arith.constant 0 : i32
    %c0_i32_1 = arith.constant 0 : i32
    return %c0_i32, %c0_i32_0 : i32, i32
  }
  func.func @transform_3(%arg0: i32, %arg1: i32) -> (i32, i32, i32) {
    %c0_i32 = arith.constant 0 : i32
    %c0_i32_0 = arith.constant 0 : i32
    return %arg0, %c0_i32, %arg1 : i32, i32, i32
  }
}

</mosaic_0001>

<bundles_post_ra>
// kernel: tpu_custom_call.1
= control target key start
LH: loop header
LB: loop body
LE: loop exit
PB: predicated region body
PF: predicated region fallthrough
CT: control target
= control target key end

     0   :  { %8 = vsyncpa [#allocation3], 0  ;;  %s1161_s0 = inlined_call_operand.hbm [shape: f32[2,4,128], index: 0, kind: input, shape index: {}]   ;;  %s1162_s1 = inlined_call_operand.hbm [shape: f32[32,4], index: 1, kind: input, shape index: {}]   ;;  %s1163_s2 = inlined_call_operand.hbm [shape: f32[32,3], index: 2, kind: input, shape index: {}]   ;;  %s1164_s3 = inlined_call_operand.hbm [shape: f32[2,32,128], index: 3, kind: output, shape index: {}]  }
   0x1   :  { %10 = vsyncpa [#allocation3 + $0x1], 0 }
   0x2   :  { %11 = vsyncpa [#allocation6], 0 }
   0x3   :  { %12 = vsyncpa [#allocation4], 0 }
   0x4   :  { %14 = vsyncpa [#allocation4 + $0x1], 0  ;;  %s908_s12 = smov 0   ;;  %s910_s13 = smov 0  }
   0x5   :  { %s912_s14 = smov 0   ;;  %s914_s15 = smov 0  }
   0x6   :  { %s916_s16 = smov 0   ;;  %s918_s17 = smov 0  }
   0x7 LB: > { %s566_s18 = sadd.s32 4294967295, %s875_s17   ;;  %s567_s19 = sadd.s32 4294967294, %s875_s17   ;;  %s875_s17 = sphi %s918_s17, %s20_s17   ;;  %s871_s16 = sphi %s916_s16, %s1186_s16   ;;  %s867_s15 = sphi %s914_s15, %s1185_s15   ;;  %s863_s14 = sphi %s912_s14, %s1184_s14   ;;  %s859_s13 = sphi %s910_s13, %s1183_s13   ;;  %s855_s12 = sphi %s908_s12, %s1182_s12  }
   0x8   : > { %p54_p0 = scmp.ne.s32.totalorder %s859_s13, %s855_s12  ;;  %p942_p1 = scmp.eq.s32.totalorder %s566_s18, 0 }
   0x9   : > { %p946_p2 = scmp.eq.s32.totalorder %s566_s18, 1  ;;  %p128_p3 = scmp.eq.s32.totalorder %s567_s19, 1 }
   0xa   : > { %s1169_s20 = scalar_select %p942_p1, 1, 0 }
   0xb   : > { %p952_p4 = por %p942_p1, %p54_p0  ;;  %p568_p5 = scmp.ge.s32.totalorder %s875_s17, 1 }
   0xc   : > { %p957_p6 = por %p128_p3, %p54_p0  ;;  %p135_p7 = scmp.lt.s32.totalorder %s875_s17, 3 }
   0xd   : > { %s1171_s22 = scalar_select %p952_p4, 1, 0 }
   0xe   : > { %s1172_s23 = scalar_select %p957_p6, 1, 0 }
   0xf   : > { %p962_p8 = pnand %p568_p5, %p135_p7  ;;  %s877_s25 = smov [#allocation5]  }
  0x10   : > { %s147_s26 = sshll.u32 %s877_s25, 4  ;;  %s878_s28 = smov [#allocation7]   ;;  %s966_s26 = int_to_ptr.vmem [resolvable:$true] %s147_s26 }
  0x11   : > { %p617_p9 = pneg %p962_p8  ;;  %s160_s29 = sshll.u32 %s878_s28, 4  ;;  %s977_s29 = int_to_ptr.vmem [resolvable:$true] %s160_s29 }
  0x12   : > { %s703_s5 = scalar_lea.hbm %s1162_s1, 512 }
  0x13   : > { %p973_p11 = pnand %p617_p9, %p942_p1  ;;  %p704_p12 = scmp.ne.s32.totalorder %s1162_s1, %s703_s5 }
  0x14   : > { %p710_p5 = scmp.lt.u32.totalorder %s703_s5, %s1162_s1 }
  0x15   : > { %p705_p13 = pneg %p973_p11 }
  0x17   : > { %p706_p0 = pnand %p705_p13, %p704_p12 }
  0x19   : > { %p707_p3 = pneg %p706_p0 }
  0x1b   : > { %p712_p7 = pnand %p710_p5, %p707_p3 }
  0x1d   : > { %715 = shalt.err (!%p712_p7)
}
  0x1e   : > { %s716_s10 = scalar_lea.vmem %s966_s26, 512  ;;  %p724_p1 = scmp.lt.s32.totalorder %s966_s26, %s966_s26 }
  0x1f   : > { %p717_p9 = scmp.ne.s32.totalorder %s966_s26, %s716_s10  ;;  %p725_p12 = scmp.lt.s32.totalorder %s716_s10, %s716_s10 }
  0x21   : > { %p719_p10 = pnand %p717_p9, %p705_p13  ;;  %p726_p0 = por %p725_p12, %p724_p1 }
  0x23   : > { %p720_p6 = pneg %p719_p10 }
  0x25   : > { %p727_p4 = pnand %p726_p0, %p720_p6 }
  0x27   : > { %730 = shalt.err (!%p727_p4)
}
  0x28   : > { %s879_s11 = smov 128   ;;  %s880_s18 = smov 8  }
  0x29   : > { %620 = dma.hbm_to_vmem [thread:$0]  (!%p973_p11), %s1162_s1, 512, %s966_s26, [#allocation6], %s879_s11, %s879_s11, %s880_s18  }
  0x2a   : > { %s731_s4 = scalar_lea.hbm %s1163_s2, 512 }
  0x2b   : > { %p732_p1 = scmp.ne.s32.totalorder %s1163_s2, %s731_s4  ;;  %p738_p10 = scmp.lt.u32.totalorder %s731_s4, %s1163_s2 }
  0x2d   : > { %p734_p4 = pnand %p732_p1, %p705_p13 }
  0x2f   : > { %p735_p6 = pneg %p734_p4 }
  0x31   : > { %p740_p3 = pnand %p738_p10, %p735_p6 }
  0x33   : > { %743 = shalt.err (!%p740_p3)
}
  0x34   : > { %s744_s26 = scalar_lea.vmem %s977_s29, 512  ;;  %p752_p12 = scmp.lt.s32.totalorder %s977_s29, %s977_s29 }
  0x35   : > { %p745_p5 = scmp.ne.s32.totalorder %s977_s29, %s744_s26  ;;  %p753_p0 = scmp.lt.s32.totalorder %s744_s26, %s744_s26 }
  0x37   : > { %p747_p7 = pnand %p745_p5, %p705_p13  ;;  %p754_p1 = por %p753_p0, %p752_p12 }
  0x39   : > { %p748_p9 = pneg %p747_p7 }
  0x3b   : > { %p755_p4 = pnand %p754_p1, %p748_p9 }
  0x3d   : > { %758 = shalt.err (!%p755_p4)
}
  0x3e   : > { %623 = dma.hbm_to_vmem [thread:$0]  (!%p973_p11), %s1163_s2, 512, %s977_s29, [#allocation6], %s879_s11, %s879_s11, %s880_s18  }
  0x3f   : > { %s32_s19 = sadd.s32 1, %s871_s16  ;;  %s41_s25 = sadd.s32 1, %s863_s14 }
  0x40   : > { %p34_p13 = scmp.ge.s32.totalorder %s32_s19, 2  ;;  %p48_p6 = scmp.ne.s32.totalorder %s863_s14, %s859_s13 }
  0x41   : > { %p49_p10 = scmp.eq.s32.totalorder %s875_s17, 0  ;;  %p634_p3 = scmp.lt.s32.totalorder %s875_s17, 2 }
  0x42   : > { %s1188_s19 = smov (%p34_p13, %s32_s19), 0  ;;  %p1041_p7 = por %p946_p2, %p48_p6 }
  0x43   : > { %p50_p5 = por %p49_p10, %p48_p6  ;;  %s36_s28 = ssub.s32 %s871_s16, %s1188_s19 }
  0x44   : > { %s1175_s27 = scalar_select %p1041_p7, 1, 0 }
  0x45   : > { %s174_s30 = sand.u32 1, %s863_s14   ;;  %p39_p9 = scmp.eq.s32.totalorder %s36_s28, 0 }
  0x46   : > { %s572_s29 = sshll.u32 %s174_s30, 2  ;;  %s573_s11 = sshll.u32 %s871_s16, 6 }
  0x47   : > { %s1050_s18 = scalar_select %p39_p9, %s863_s14, %s41_s25  }
  0x48   : > { %s1055_s6 = scalar_lea.hbm %s1161_s0, %s573_s11  ;;  %s178_s21 = scalar_lea.vmem [#allocation2], %s572_s29 }
  0x49   : > { %s186_s7 = sshll.u32 %s178_s21, 4  ;;  %p1059_p2 = pnand %p634_p3, %p50_p5  ;;  %s1063_s7 = int_to_ptr.vmem [resolvable:$true] %s186_s7 }
  0x4a   : > { %s175_s26 = scalar_lea.sflag [#allocation3], %s174_s30  ;;  %s759_s9 = scalar_lea.hbm %s1055_s6, 64 }
  0x4b   : > { %p760_p11 = scmp.ne.s32.totalorder %s1055_s6, %s759_s9  ;;  %p761_p12 = pneg %p1059_p2 }
  0x4c   : > { %s764_s28 = scalar_lea.hbm %s1161_s0, 128  ;;  %p765_p4 = scmp.lt.u32.totalorder %s1055_s6, %s1161_s0 }
  0x4d   : > { %p762_p0 = pnand %p761_p12, %p760_p11  ;;  %p766_p13 = scmp.lt.u32.totalorder %s764_s28, %s759_s9 }
  0x4e   : > { %p768_p10 = scmp.lt.u32.totalorder %s759_s9, %s1055_s6 }
  0x4f   : > { %p763_p1 = pneg %p762_p0  ;;  %p767_p6 = por %p766_p13, %p765_p4 }
  0x51   : > { %p769_p3 = por %p768_p10, %p767_p6 }
  0x53   : > { %p770_p5 = pnand %p769_p3, %p763_p1 }
  0x55   : > { %773 = shalt.err (!%p770_p5)
}
  0x56   : > { %s774_s30 = scalar_lea.vmem %s1063_s7, 64  ;;  %s881_s4 = smov [#allocation2]  }
  0x57   : > { %p775_p9 = scmp.ne.s32.totalorder %s1063_s7, %s774_s30  ;;  %s779_s5 = sshll.u32 %s881_s4, 4  ;;  %s780_s5 = int_to_ptr.vmem [resolvable:$false] %s779_s5 }
  0x58   : > { %s781_s21 = scalar_lea.vmem %s780_s5, 128  ;;  %p782_p7 = scmp.lt.s32.totalorder %s1063_s7, %s780_s5 }
  0x59   : > { %p777_p11 = pnand %p775_p9, %p761_p12  ;;  %p783_p4 = scmp.lt.s32.totalorder %s781_s21, %s774_s30 }
  0x5b   : > { %p778_p0 = pneg %p777_p11  ;;  %p784_p13 = por %p783_p4, %p782_p7 }
  0x5d   : > { %p785_p6 = pnand %p784_p13, %p778_p0 }
  0x5f   : > { %788 = shalt.err (!%p785_p6)
}
  0x60   : > { %627 = dma.hbm_to_vmem [thread:$0]  (!%p1059_p2), %s1055_s6, 64, %s1063_s7, %s175_s26  }
  0x61   : > { %195 = sbr.rel (%p962_p8) target bundleno = 391 (0x187), region = 32  ;;  %s1093_s9 = sand.u32 (!%p962_p8), 1, %s859_s13  }
  0x62   : > { %s575_s10 = sshll.u32 (!%p962_p8), %s1093_s9, 2  ;;  %s198_s25 = scalar_lea.sflag (!%p962_p8), [#allocation3], %s1093_s9 }
  0x63   : > { %s201_s28 = scalar_lea.vmem (!%p962_p8), [#allocation2], %s575_s10  ;;  %p1177_p7 = scmp.ne.s32.totalorder (!%p962_p8), %s1171_s22, 0 }
  0x68   : > { %842 = dma.done.wait (%p1177_p7), %s198_s25, 64  }
  0x69   : > { %844 = vsyncadd (%p1177_p7), %s198_s25, 4294967232  ;;  %p1178_p12 = scmp.ne.s32.totalorder %s1169_s20, 0 }
  0x6b   : > { %846 = dma.done.wait (%p1178_p12), [#allocation6], 1024  }
  0x6c   : > { %848 = vsyncadd (%p1178_p12), [#allocation6], 4294966272  ;;  %v882_v0 = vmov 0   ;;  %vm274_vm0 = vcmask 1043456   ;;  %v232_v1 = vld [vmem:[%s201_s28] sm:$0xf] }
  0x6d   : > { %695 = vset.pattern.permute.xlu0 %v882_v0  ;;  %696 = vset.pattern.permute.xlu1 %v882_v0  ;;  %v233_v2 = vld [vmem:[#allocation5] sm:$0xff]  ;;  %vm261_vm1 = vcmask 31744   ;;  %v235_v3 = vld [vmem:[#allocation5 + $0x10] sm:$0xff]  ;;  %v234_v4 = vld [vmem:[#allocation5 + $0x8] sm:$0xff]  ;;  %v883_v10 = vmov 1   ;;  %v884_v11 = vmov 2  }
  0x6e   : > { %595 = vmatprep.subr.msk.mxu0 %vm274_vm0, %v232_v1  ;;  %603 = vmatprep.subr.msk.mxu1 %vm274_vm0, %v232_v1  ;;  %v236_v5 = vld [vmem:[#allocation5 + $0x18] sm:$0xff]  ;;  %v237_v6 = vld [vmem:[#allocation7] sm:$0xff]  ;;  %v239_v7 = vld [vmem:[#allocation7 + $0x10] sm:$0xff]  ;;  %s578_s20 = sshll.u32 %s1093_s9, 5  ;;  %s589_s6 = sshll.u32 %s867_s15, 9 }
  0x6f   : > { %596 = vmatpush3.msk.msra.mxu0 %vm274_vm0, %v232_v1  ;;  %604 = vmatpush3.msk.msra.mxu1 %vm274_vm0, %v232_v1  ;;  %v238_v8 = vld [vmem:[#allocation7 + $0x8] sm:$0xff]  ;;  %v240_v9 = vld [vmem:[#allocation7 + $0x18] sm:$0xff]  ;;  %s231_s22 = scalar_lea.vmem [#allocation8], %s578_s20  ;;  %s1112_s26 = scalar_lea.hbm %s1164_s3, %s589_s6 }
  0x70   : > { %597 = vmatprep.mubr.msk.f32.mxu0 %vm261_vm1, %v233_v2  ;;  %600 = vmatprep.mubr.msk.f32.mxu1 %vm261_vm1, %v235_v3  ;;  %s463_s24 = sshll.u32 %s231_s22, 4  ;;  %s449_s15 = scalar_lea.sflag [#allocation4], %s1093_s9  ;;  %s1107_s24 = int_to_ptr.vmem [resolvable:$true] %s463_s24 }
  0x71   : > { %598 = vmatmul.mubr.msk.f32.vlgmr.msra.gmra.mrb[0].mxu0 %vm261_vm1, %v234_v4  ;;  %601 = vmatmul.mubr.msk.f32.vlgmr.msra.gmra.mrb[0].mxu1 %vm261_vm1, %v236_v5  ;;  %s789_s29 = scalar_lea.vmem %s1107_s24, 512  ;;  %p1179_p2 = scmp.ne.s32.totalorder %s1175_s27, 0 }
  0x72   : > { %243 = vperm.xlu0 %695, %v237_v6   ;;  %253 = vperm.xlu1 %696, %v239_v7   ;;  %p790_p8 = scmp.ne.s32.totalorder %s1107_s24, %s789_s29  ;;  %s885_s11 = smov [#allocation8]  }
  0x73   : > { %s793_s30 = sshll.u32 %s885_s11, 4  ;;  %s794_s30 = int_to_ptr.vmem [resolvable:$false] %s793_s30 }
  0x74   : > { %p791_p1 = pnand %p790_p8, %p1179_p2  ;;  %s795_s4 = scalar_lea.vmem %s794_s30, 1024 }
  0x75   : > { %p796_p3 = scmp.lt.s32.totalorder %s1107_s24, %s794_s30  ;;  %p797_p5 = scmp.lt.s32.totalorder %s795_s4, %s789_s29 }
  0x76   : > { %248 = vperm.xlu0 %695, %v238_v8   ;;  %258 = vperm.xlu1 %696, %v240_v9   ;;  %p792_p10 = pneg %p791_p1 }
  0x77   : > { %p798_p9 = por %p797_p5, %p796_p3 }
  0x79   : > { %p799_p11 = pnand %p798_p9, %p792_p10 }
  0x7a   : > { %698 = vset.pattern.permute.xlu1 %v883_v10  ;;  %697 = vset.pattern.permute.xlu0 %v883_v10 }
  0x7b   : > { %409 = vperm.xlu1 %698, %v238_v8   ;;  %405 = vperm.xlu0 %697, %v237_v6  }
  0x7f   : > { %413 = vperm.xlu1 %698, %v239_v7   ;;  %417 = vperm.xlu0 %697, %v240_v9  }
  0x83   : > { %699 = vset.pattern.permute.xlu1 %v884_v11  ;;  %700 = vset.pattern.permute.xlu0 %v884_v11 }
  0x84   : > { %425 = vperm.xlu1 %699, %v237_v6   ;;  %429 = vperm.xlu0 %700, %v238_v8  }
  0x88   : > { %433 = vperm.xlu1 %699, %v239_v7  }
  0x8c   : > { %437 = vperm.xlu1 %699, %v240_v9  }
  0xf1   : > { %v244_v12 = vpop.permute.xlu0 %243  ;;  %v254_v13 = vpop.permute.xlu1 %253 }
  0xf5   : > { %v249_v14 = vpop.permute.xlu0 %248  ;;  %v259_v15 = vpop.permute.xlu1 %258 }
  0xfa   : > { %v410_v51 = vpop.permute.xlu1 %409  ;;  %v406_v63 = vpop.permute.xlu0 %405 }
  0xfe   : > { %v414_v60 = vpop.permute.xlu1 %413  ;;  %v418_v1 = vpop.permute.xlu0 %417 }
 0x103   : > { %v426_v62 = vpop.permute.xlu1 %425  ;;  %v430_v7 = vpop.permute.xlu0 %429 }
 0x107   : > { %v434_v0 = vpop.permute.xlu1 %433 }
 0x144   : > { %v599_v16 = vpop.f32.mrb[0].mxu0  ;;  %v602_v17 = vpop.f32.mrb[0].mxu1 }
 0x145   : > { %v350_v18 = vadd.f32 %v599_v16, %v249_v14  ;;  %v344_v19 = vpop.f32.mrb[1].mxu0  ;;  %v354_v20 = vpop.f32.mrb[1].mxu1  ;;  %v360_v21 = vadd.f32 %v602_v17, %v259_v15 }
 0x146   : > { %v345_v22 = vadd.f32 %v344_v19, %v244_v12  ;;  %v355_v23 = vadd.f32 %v354_v20, %v254_v13  ;;  %v438_v12 = vpop.permute.xlu1 %437 }
 0x147   : > { %v364_v24 = vmax.f32 %v350_v18, 0.0  ;;  %v366_v28 = vmax.f32 %v360_v21, 0.0 }
 0x148   : > { %v363_v25 = vmax.f32 %v345_v22, 0.0  ;;  %v365_v26 = vmax.f32 %v355_v23, 0.0 }
 0x149   : > { %v378_v27 = vmul.f32 %v364_v24, %v364_v24  ;;  %v380_v34 = vmul.f32 %v366_v28, %v366_v28 }
 0x14a   : > { %v367_v29 = vadd.f32 %v364_v24, %v363_v25  ;;  %v377_v30 = vmul.f32 %v363_v25, %v363_v25  ;;  %v379_v33 = vmul.f32 %v365_v26, %v365_v26 }
 0x14c   : > { %v381_v31 = vadd.f32 %v378_v27, %v377_v30  ;;  %v368_v32 = vadd.f32 %v367_v29, %v365_v26 }
 0x14e   : > { %v369_v35 = vadd.f32 %v368_v32, %v366_v28  ;;  %v382_v36 = vadd.f32 %v381_v31, %v379_v33 }
 0x150   : > { %v370_v37 = vrot.slane %v369_v35, 4  ;;  %v383_v38 = vadd.f32 %v382_v36, %v380_v34 }
 0x152   : > { %v371_v39 = vadd.f32 %v370_v37, %v369_v35  ;;  %v384_v40 = vrot.slane %v383_v38, 4 }
 0x154   : > { %v372_v41 = vrot.slane %v371_v39, 2  ;;  %v385_v42 = vadd.f32 %v384_v40, %v383_v38 }
 0x156   : > { %v373_v43 = vadd.f32 %v372_v41, %v371_v39  ;;  %v386_v44 = vrot.slane %v385_v42, 2 }
 0x158   : > { %v374_v45 = vrot.slane %v373_v43, 1  ;;  %v387_v46 = vadd.f32 %v386_v44, %v385_v42 }
 0x15a   : > { %v375_v47 = vadd.f32 %v374_v45, %v373_v43  ;;  %v388_v48 = vrot.slane %v387_v46, 1 }
 0x15c   : > { %v376_v49 = vmul.f32 0.03125, %v375_v47  ;;  %v389_v50 = vadd.f32 %v388_v48, %v387_v46 }
 0x15e   : > { %v390_v52 = vmul.f32 0.03125, %v389_v50  ;;  %v391_v53 = vmul.f32 %v376_v49, %v376_v49  ;;  %v397_v54 = vsub.f32 %v364_v24, %v376_v49  ;;  %v398_v55 = vsub.f32 %v365_v26, %v376_v49 }
 0x15f   : > { %v396_v56 = vsub.f32 %v363_v25, %v376_v49  ;;  %v399_v57 = vsub.f32 %v366_v28, %v376_v49 }
 0x160   : > { %v392_v58 = vsub.f32 %v390_v52, %v391_v53 }
 0x162   : > { %v393_v59 = vmax.f32 %v392_v58, 0.0 }
 0x164   : > { %v394_v61 = vadd.f32 1e-05, %v393_v59 }
 0x166   : > { %701 = vrsqrt.f32 %v394_v61 }
 0x170   : > { %v702_v2 = vpop.eup %701 }
 0x171   : > { %v401_v3 = vmul.f32 %v702_v2, %v397_v54  ;;  %v402_v4 = vmul.f32 %v702_v2, %v398_v55  ;;  %v400_v5 = vmul.f32 %v702_v2, %v396_v56  ;;  %v403_v6 = vmul.f32 %v702_v2, %v399_v57 }
 0x173   : > { %v421_v8 = vmul.f32 %v410_v51, %v401_v3  ;;  %v422_v9 = vmul.f32 %v414_v60, %v402_v4  ;;  %v420_v10 = vmul.f32 %v406_v63, %v400_v5  ;;  %v423_v11 = vmul.f32 %v418_v1, %v403_v6 }
 0x175   : > { %v440_v13 = vadd.f32 %v426_v62, %v420_v10  ;;  %v442_v14 = vadd.f32 %v434_v0, %v422_v9  ;;  %v443_v15 = vadd.f32 %v438_v12, %v423_v11  ;;  %v441_v16 = vadd.f32 %v430_v7, %v421_v8 }
 0x177   : > { %444 = vst [vmem:[%s231_s22] sm:$0xff] %v440_v13  ;;  %446 = vst [vmem:[%s231_s22 + $0x10] sm:$0xff] %v442_v14 }
 0x178   : > { %447 = vst [vmem:[%s231_s22 + $0x18] sm:$0xff] %v443_v15  ;;  %445 = vst [vmem:[%s231_s22 + $0x8] sm:$0xff] %v441_v16 }
 0x179   : > { %802 = shalt.err (!%p799_p11)
}
 0x17a   : > { %s803_s5 = scalar_lea.hbm %s1112_s26, 512  ;;  %s807_s25 = scalar_lea.hbm %s1164_s3, 1024 }
 0x17b   : > { %p804_p0 = scmp.ne.s32.totalorder %s1112_s26, %s803_s5  ;;  %p808_p6 = scmp.lt.u32.totalorder %s1112_s26, %s1164_s3 }
 0x17c   : > { %p809_p7 = scmp.lt.u32.totalorder %s807_s25, %s803_s5  ;;  %p811_p8 = scmp.lt.u32.totalorder %s803_s5, %s1112_s26 }
 0x17d   : > { %p805_p4 = pnand %p804_p0, %p1179_p2 }
 0x17e   : > { %p810_p12 = por %p809_p7, %p808_p6 }
 0x17f   : > { %p806_p13 = pneg %p805_p4 }
 0x180   : > { %p812_p1 = por %p811_p8, %p810_p12 }
 0x182   : > { %p813_p10 = pnand %p812_p1, %p806_p13 }
 0x184   : > { %816 = shalt.err (!%p813_p10)
}
 0x185   : > { %s886_s22 = smov 128   ;;  %s887_s6 = smov 8  }
 0x186   : > { %615 = dma.vmem_to_hbm [thread:$0]  (%p1179_p2), %s1107_s24, 512, %s1112_s26, %s449_s15, %s886_s22, %s886_s22, %s887_s6  }
 0x187 PF: > { %s478_s7 = sand.u32 1, %s855_s12   ;;  %p1180_p3 = scmp.ne.s32.totalorder %s1172_s23, 0 }
 0x188   : > { %p1181_p5 = scmp.ge.s32.totalorder %s875_s17, 2  ;;  %s479_s8 = scalar_lea.sflag [#allocation4], %s478_s7 }
 0x18a   : > { %p629_p9 = pnand %p1181_p5, %p1180_p3 }
 0x18c   : > { %850 = dma.done.wait (!%p629_p9), %s479_s8, 512  }
 0x18d   : > { %852 = vsyncadd (!%p629_p9), %s479_s8, 4294966784  ;;  %s20_s17 = sadd.s32 1, %s875_s17   ;;  %s1182_s12 = smov %s859_s13 }
 0x18e   : > { %p17_p11 = scmp.ge.s32.totalorder %s20_s17, 4   ;;  %s1183_s13 = smov %s863_s14 }
 0x18f   : > { %s1184_s14 = smov %s1050_s18  ;;  %s1185_s15 = smov %s871_s16 }
 0x190   : > { %s1186_s16 = smov %s1188_s19  ;;  %19 = sbr.rel (!%p17_p11) target bundleno = 7 (0x7), region = 85 }
 0x197   :  { %484 = vsyncpa [#allocation3], 1 }
 0x198   :  { %486 = vsyncpa [#allocation3 + $0x1], 1 }
 0x199   :  { %487 = vsyncpa [#allocation6], 1 }
 0x19a   :  { %488 = vsyncpa [#allocation4], 1 }
 0x19b   :  { %490 = vsyncpa [#allocation4 + $0x1], 1 }

</bundles_post_ra>
